<compile_context>
chip_gen: v7x
topology: tpu7x:2x2x1
jax: 0.10.0
libtpu: 0.0.40
codegen_flags: <defaults>
</compile_context>

<pallas_src>
import functools

import jax
import jax.numpy as jnp
from jax import lax
from jax.experimental import pallas as pl
from jax.experimental.pallas import tpu as pltpu


_TILE_BYTES = 1 << 20                # ~1 MiB f32 tiles (good across v5e/v6e/v7x)
_PASS2_VMEM_LIMIT = 48 * 1024 * 1024  # 8 tile streams * 2 bufs > v5e's 16 MiB default


# --------------------------------------------------------------------------- #
# Pass 1: per-tile BCE-with-logits partial sums (parallel grid, VPU-only reduce)
# --------------------------------------------------------------------------- #
def _bce_partial_kernel(x_ref, t_ref, part_ref, *, lanes, tile_r, n_valid,
                        need_mask, vreg_path):
    f32 = jnp.float32
    x = x_ref[...].astype(f32)
    t = t_ref[...].astype(f32)
    # stable BCE-with-logits: max(x,0) - x*t + log1p(exp(-|x|))
    bce = jnp.maximum(x, 0.0) - x * t + jnp.log1p(jnp.exp(-jnp.abs(x)))

    if need_mask:
        # Zero contributions from the ragged tail / out-of-bounds rows of the
        # last (partial) block.  Garbage reads there are masked before summing.
        row = (lax.broadcasted_iota(jnp.int32, bce.shape, 0)
               + pl.program_id(0) * tile_r)
        col = lax.broadcasted_iota(jnp.int32, bce.shape, 1)
        bce = jnp.where(row * lanes + col < n_valid, bce, 0.0)

    if vreg_path:
        # Pure-VPU reduction: add statically sliced (8, lanes) row groups, then
        # fold 128-lane chunks.  Static, sublane/lane-aligned slices are views.
        acc = bce[0:8, :]
        for r in range(8, tile_r, 8):
            acc = acc + bce[r:r + 8, :]
        part = acc[:, 0:128]
        for c in range(128, lanes, 128):
            part = part + acc[:, c:c + 128]
    else:
        # Tiny single-block case (rows not a multiple of 8): scalar reduce,
        # stored at [0, 0] of an otherwise-zero (8, 128) partial.
        s = jnp.sum(bce)
        ri = lax.broadcasted_iota(jnp.int32, (8, 128), 0)
        ci = lax.broadcasted_iota(jnp.int32, (8, 128), 1)
        part = jnp.where((ri == 0) & (ci == 0), s, 0.0)

    part_ref[...] = part.reshape(1, 8, 128)


# --------------------------------------------------------------------------- #
# Pass 2: elementwise DFL + Wise-IoU + weighted combine (embarrassingly parallel)
# --------------------------------------------------------------------------- #
def _combine_kernel(bce_ref, t_ref, si_ref, si1_ref,
                    xp_ref, yp_ref, xgt_ref, ygt_ref, out_ref,
                    *, lam2, lam3_coef, exp_scale):
    f32 = jnp.float32
    t = t_ref[...].astype(f32)
    s_i = si_ref[...].astype(f32)
    s_i1 = si1_ref[...].astype(f32)

    # DFL: -((t - s_i)*log(s_i) + (s_i1 - t)*log(s_i1)), sign-folded.
    dfl = (s_i - t) * jnp.log(s_i) + (t - s_i1) * jnp.log(s_i1)

    # Wise-IoU: coef * exp(d/(b^2+g^2))**delta == coef * exp(exp_scale * d).
    dx = xp_ref[...].astype(f32) - xgt_ref[...].astype(f32)
    dy = yp_ref[...].astype(f32) - ygt_ref[...].astype(f32)
    wiou = jnp.exp(exp_scale * (dx * dx + dy * dy))

    # bce_ref holds lambda1 * mean(BCE); lam2/lam3_coef fold the other lambdas.
    out_ref[...] = (bce_ref[0, 0] + lam2 * dfl + lam3_coef * wiou).astype(out_ref.dtype)


# --------------------------------------------------------------------------- #
# Wrapper
# --------------------------------------------------------------------------- #
def _layout(n):
    """Pick a lane width so reshape to (rows, lanes) is a free (copy-less) view."""
    for lanes in (512, 256, 128):
        if n % lanes == 0:
            return lanes, n // lanes, False
    # Rare ragged fallback (n not 128-aligned): minimal pad + final slice.
    return 128, pl.cdiv(n, 128), True


def custom_loss(classification_preds, classification_targets,
                regression_preds, regression_targets,          # unused (as in PyTorch)
                S_i, S_i1,
                x_p, y_p, x_gt, y_gt,
                W_p, H_p, W_gt, H_gt,                           # only feed dead S_u
                *, lambda1, lambda2, lambda3, alpha, beta, delta, gamma):
    """Inputs may be f32 or bf16; kernels upcast on-chip (bf16 halves HBM traffic)."""
    del regression_preds, regression_targets, W_p, H_p, W_gt, H_gt  # dead in forward

    orig_shape = classification_preds.shape
    n = 1
    for d in orig_shape:
        n *= d

    lanes, rows, needs_pad = _layout(n)
    tile_cap = max(8, _TILE_BYTES // (4 * lanes))      # rows per ~1 MiB f32 tile
    tile_r = rows if rows <= tile_cap else tile_cap
    num_tiles = pl.cdiv(rows, tile_r)
    need_mask = (rows * lanes != n) or (rows % tile_r != 0)
    vreg_path = (tile_r % 8 == 0) and (lanes % 128 == 0)

    def as_slab(a):
        a = jnp.asarray(a).reshape(-1)
        if needs_pad:                                   # rare: n % 128 != 0
            a = jnp.pad(a, (0, rows * lanes - a.shape[0]))
        return a.reshape(rows, lanes)                   # free reshape otherwise

    x2d = as_slab(classification_preds)
    t2d = as_slab(classification_targets)
    si2d = as_slab(S_i)
    si12d = as_slab(S_i1)
    xp2d = as_slab(x_p)
    yp2d = as_slab(y_p)
    xgt2d = as_slab(x_gt)
    ygt2d = as_slab(y_gt)

    tile_spec = pl.BlockSpec((tile_r, lanes), lambda i: (i, 0))

    # ---- pass 1: per-tile BCE partial sums (parallel across TCs on v7x) ---- #
    bce_kernel = functools.partial(
        _bce_partial_kernel, lanes=lanes, tile_r=tile_r, n_valid=n,
        need_mask=need_mask, vreg_path=vreg_path)

    p1_bytes = (x2d.size * x2d.dtype.itemsize + t2d.size * t2d.dtype.itemsize
                + num_tiles * 8 * 128 * 4)
    partials = pl.pallas_call(
        bce_kernel,
        out_shape=jax.ShapeDtypeStruct((num_tiles, 8, 128), jnp.float32),
        grid=(num_tiles,),
        in_specs=[tile_spec, tile_spec],
        out_specs=pl.BlockSpec((1, 8, 128), lambda i: (i, 0, 0)),
        compiler_params=pltpu.CompilerParams(
            dimension_semantics=("parallel",)),
        cost_estimate=pl.CostEstimate(
            flops=int(8 * n), transcendentals=int(2 * n),
            bytes_accessed=int(p1_bytes)),
    )(x2d, t2d)

    # lambda1 * mean(BCE) as a (1,1) SMEM scalar for pass 2 (tiny XLA reduce).
    bce_term = (jnp.sum(partials) * jnp.float32(float(lambda1) / float(n))
                ).reshape(1, 1).astype(jnp.float32)

    # ---- pass 2: elementwise combine --------------------------------------- #
    coef = 1.0 - beta * alpha * beta * alpha * gamma
    combine_kernel = functools.partial(
        _combine_kernel,
        lam2=float(lambda2),
        lam3_coef=float(lambda3 * coef),
        exp_scale=float(delta / (beta * beta + gamma * gamma)))

    p2_bytes = (sum(a.size * a.dtype.itemsize
                    for a in (t2d, si2d, si12d, xp2d, yp2d, xgt2d, ygt2d))
                + rows * lanes * 4)
    out2d = pl.pallas_call(
        combine_kernel,
        out_shape=jax.ShapeDtypeStruct((rows, lanes), jnp.float32),
        grid=(num_tiles,),
        in_specs=[pl.BlockSpec(memory_space=pltpu.MemorySpace.SMEM)]
                 + [tile_spec] * 7,
        out_specs=tile_spec,
        compiler_params=pltpu.CompilerParams(
            dimension_semantics=("parallel",),
            vmem_limit_bytes=_PASS2_VMEM_LIMIT),
        cost_estimate=pl.CostEstimate(
            flops=int(14 * n), transcendentals=int(3 * n),
            bytes_accessed=int(p2_bytes)),
    )(bce_term, t2d, si2d, si12d, xp2d, yp2d, xgt2d, ygt2d)

    if rows * lanes != n:            # only in the rare n % 128 != 0 fallback
        return out2d.reshape(-1)[:n].reshape(orig_shape)
    return out2d.reshape(orig_shape)  # free reshape


# --------------------------------------------------------------------------- #
# Pure-JAX reference (original, un-folded formulas)
# --------------------------------------------------------------------------- #
def _reference(cls_p, cls_t, s_i, s_i1, x_p, y_p, x_gt, y_gt,
               *, lambda1, lambda2, lambda3, alpha, beta, delta, gamma):
    bce = jnp.mean(jnp.maximum(cls_p, 0.0) - cls_p * cls_t
                   + jnp.log1p(jnp.exp(-jnp.abs(cls_p))))
    dfl = -((cls_t - s_i) * jnp.log(s_i) + (s_i1 - cls_t) * jnp.log(s_i1))
    wiou = (1.0 - beta * alpha * beta * alpha * gamma) * \
        jnp.exp(((x_p - x_gt) ** 2 + (y_p - y_gt) ** 2)
                / (beta ** 2 + gamma ** 2)) ** delta
    return lambda1 * bce + lambda2 * dfl + lambda3 * wiou


if __name__ == "__main__":
    hypers = dict(lambda1=0.5, lambda2=0.3, lambda3=0.2,
                  alpha=0.25, beta=1.5, delta=0.5, gamma=2.0)
    loss_fn = jax.jit(functools.partial(custom_loss, **hypers))

    def make_inputs(key, shape):
        ks = jax.random.split(key, 12)
        cls_preds = jax.random.normal(ks[0], shape, jnp.float32)             # logits
        cls_targets = (jax.random.uniform(ks[1], shape) > 0.5).astype(jnp.float32)
        reg_preds = jax.random.normal(ks[2], shape, jnp.float32)             # unused
        reg_targets = jax.random.normal(ks[3], shape, jnp.float32)           # unused
        S_i = jax.random.uniform(ks[4], shape, jnp.float32, 0.05, 0.95)
        S_i1 = jax.random.uniform(ks[5], shape, jnp.float32, 0.05, 0.95)
        x_p = jax.random.normal(ks[6], shape, jnp.float32)
        y_p = jax.random.normal(ks[7], shape, jnp.float32)
        x_gt = jax.random.normal(ks[8], shape, jnp.float32)
        y_gt = jax.random.normal(ks[9], shape, jnp.float32)
        W_p = jax.random.uniform(ks[10], shape, jnp.float32, 0.5, 2.0)
        H_p = jax.random.uniform(ks[11], shape, jnp.float32, 0.5, 2.0)
        W_gt = W_p * 1.1
        H_gt = H_p * 0.9
        return (cls_preds, cls_targets, reg_preds, reg_targets, S_i, S_i1,
                x_p, y_p, x_gt, y_gt, W_p, H_p, W_gt, H_gt)

    def run_case(shape, rtol, atol):
        args = make_inputs(jax.random.PRNGKey(0), shape)
        out = loss_fn(*args)
        out = jax.block_until_ready(out)
        ref = _reference(args[0], args[1], args[4], args[5],
                         args[6], args[7], args[8], args[9], **hypers)
        assert out.shape == shape, f"shape mismatch at {shape}"
        assert out.dtype == jnp.float32
        assert jnp.allclose(out, ref, rtol=rtol, atol=atol), f"mismatch at {shape}"

    # Small NCHW classification shape (grid=(1,), full-extent block, scalar reduce path).
    run_case((2, 4, 16, 16), rtol=1e-5, atol=1e-5)
    # Larger shape: multi-tile parallel grid, partial last block handled by in-kernel mask.
    run_case((2, 16, 160, 128), rtol=1e-4, atol=1e-4)
    # Ragged size (n % 128 != 0): exercises the minimal-pad fallback + in-kernel mask.
    run_case((3, 5, 7), rtol=1e-5, atol=1e-5)

    print("KERNEL_OK")
</pallas_src>

<mosaic_0001>
module attributes {stable_mosaic.version = 11 : i64} {
  func.func @_bce_partial_kernel(%arg0: i32, %arg1: memref<4x512xf32, #tpu.memory_space<vmem>>, %arg2: memref<4x512xf32, #tpu.memory_space<vmem>>, %arg3: memref<1x8x128xf32, #tpu.memory_space<vmem>>) attributes {dimension_semantics = [#tpu.dimension_semantics<parallel>], iteration_bounds = array<i64: 1>, scalar_prefetch = 0 : i64, scratch_operands = 0 : i64, tpu.core_type = #tpu.core_type<tc>, window_params = [{transform_indices = @transform_0, window_bounds = array<i64: 4, 512>}, {transform_indices = @transform_1, window_bounds = array<i64: 4, 512>}, {transform_indices = @transform_2, window_bounds = array<i64: 1, 8, 128>}]} {
    %c0 = arith.constant 0 : index
    %c0_0 = arith.constant 0 : index
    %0 = vector.load %arg1[%c0, %c0_0] : memref<4x512xf32, #tpu.memory_space<vmem>>, vector<4x512xf32>
    %c0_1 = arith.constant 0 : index
    %c0_2 = arith.constant 0 : index
    %1 = vector.load %arg2[%c0_1, %c0_2] : memref<4x512xf32, #tpu.memory_space<vmem>>, vector<4x512xf32>
    %cst = arith.constant 0.000000e+00 : f32
    %2 = vector.broadcast %cst : f32 to vector<4x512xf32>
    %3 = arith.maximumf %0, %2 : vector<4x512xf32>
    %4 = arith.mulf %0, %1 : vector<4x512xf32>
    %5 = arith.subf %3, %4 : vector<4x512xf32>
    %6 = math.absf %0 : vector<4x512xf32>
    %cst_3 = arith.constant 0.000000e+00 : f32
    %7 = vector.broadcast %cst_3 : f32 to vector<4x512xf32>
    %8 = arith.subf %7, %6 : vector<4x512xf32>
    %9 = math.exp %8 : vector<4x512xf32>
    %10 = math.log1p %9 : vector<4x512xf32>
    %11 = arith.addf %5, %10 : vector<4x512xf32>
    %12 = vector.shape_cast %11 : vector<4x512xf32> to vector<1x4x512xf32>
    %cst_4 = arith.constant dense<0.000000e+00> : vector<1xf32>
    %13 = vector.multi_reduction <add>, %12, %cst_4 [1, 2] : vector<1x4x512xf32> to vector<1xf32>
    %14 = vector.shape_cast %13 : vector<1xf32> to vector<1x1x1xf32>
    %15 = vector.extract %14[0, 0, 0] : f32 from vector<1x1x1xf32>
    %16 = tpu.iota {dimensions = array<i32: 0>} : vector<8x128xi32>
    %17 = tpu.iota {dimensions = array<i32: 1>} : vector<8x128xi32>
    %c0_i32 = arith.constant 0 : i32
    %18 = vector.broadcast %c0_i32 : i32 to vector<8x128xi32>
    %19 = arith.cmpi eq, %16, %18 : vector<8x128xi32>
    %c0_i32_5 = arith.constant 0 : i32
    %20 = vector.broadcast %c0_i32_5 : i32 to vector<8x128xi32>
    %21 = arith.cmpi eq, %17, %20 : vector<8x128xi32>
    %22 = arith.andi %19, %21 : vector<8x128xi1>
    %cst_6 = arith.constant 0.000000e+00 : f32
    %23 = vector.broadcast %15 : f32 to vector<8x128xf32>
    %24 = vector.broadcast %cst_6 : f32 to vector<8x128xf32>
    %25 = arith.select %22, %23, %24 : vector<8x128xi1>, vector<8x128xf32>
    %26 = vector.shape_cast %25 : vector<8x128xf32> to vector<1x8x128xf32>
    %c0_7 = arith.constant 0 : index
    %c0_8 = arith.constant 0 : index
    %c0_9 = arith.constant 0 : index
    %27 = vector.load %arg3[%c0_7, %c0_8, %c0_9] : memref<1x8x128xf32, #tpu.memory_space<vmem>>, vector<1x8x128xf32>
    tpu.vector_store %arg3[%c0_7, %c0_8, %c0_9], %26 {strides = array<i32>} : memref<1x8x128xf32, #tpu.memory_space<vmem>>, vector<1x8x128xf32>,
    return
  }
  func.func @transform_0(%arg0: i32) -> (i32, i32) {
    %c0_i32 = arith.constant 0 : i32
    %c0_i32_0 = arith.constant 0 : i32
    return %arg0, %c0_i32 : i32, i32
  }
  func.func @transform_1(%arg0: i32) -> (i32, i32) {
    %c0_i32 = arith.constant 0 : i32
    %c0_i32_0 = arith.constant 0 : i32
    return %arg0, %c0_i32 : i32, i32
  }
  func.func @transform_2(%arg0: i32) -> (i32, i32, i32) {
    %c0_i32 = arith.constant 0 : i32
    %c0_i32_0 = arith.constant 0 : i32
    %c0_i32_1 = arith.constant 0 : i32
    return %arg0, %c0_i32, %c0_i32_0 : i32, i32, i32
  }
}

module attributes {stable_mosaic.version = 11 : i64} {
  func.func @_combine_kernel(%arg0: i32, %arg1: memref<1x1xf32, #tpu.memory_space<smem>>, %arg2: memref<4x512xf32, #tpu.memory_space<vmem>>, %arg3: memref<4x512xf32, #tpu.memory_space<vmem>>, %arg4: memref<4x512xf32, #tpu.memory_space<vmem>>, %arg5: memref<4x512xf32, #tpu.memory_space<vmem>>, %arg6: memref<4x512xf32, #tpu.memory_space<vmem>>, %arg7: memref<4x512xf32, #tpu.memory_space<vmem>>, %arg8: memref<4x512xf32, #tpu.memory_space<vmem>>, %arg9: memref<4x512xf32, #tpu.memory_space<vmem>>) attributes {dimension_semantics = [#tpu.dimension_semantics<parallel>], iteration_bounds = array<i64: 1>, scalar_prefetch = 0 : i64, scratch_operands = 0 : i64, tpu.core_type = #tpu.core_type<tc>, window_params = [{transform_indices = @transform_0, window_bounds = array<i64: 1, 1>}, {transform_indices = @transform_1, window_bounds = array<i64: 4, 512>}, {transform_indices = @transform_2, window_bounds = array<i64: 4, 512>}, {transform_indices = @transform_3, window_bounds = array<i64: 4, 512>}, {transform_indices = @transform_4, window_bounds = array<i64: 4, 512>}, {transform_indices = @transform_5, window_bounds = array<i64: 4, 512>}, {transform_indices = @transform_6, window_bounds = array<i64: 4, 512>}, {transform_indices = @transform_7, window_bounds = array<i64: 4, 512>}, {transform_indices = @transform_8, window_bounds = array<i64: 4, 512>}]} {
    %c0 = arith.constant 0 : index
    %c0_0 = arith.constant 0 : index
    %0 = vector.load %arg2[%c0, %c0_0] : memref<4x512xf32, #tpu.memory_space<vmem>>, vector<4x512xf32>
    %c0_1 = arith.constant 0 : index
    %c0_2 = arith.constant 0 : index
    %1 = vector.load %arg3[%c0_1, %c0_2] : memref<4x512xf32, #tpu.memory_space<vmem>>, vector<4x512xf32>
    %c0_3 = arith.constant 0 : index
    %c0_4 = arith.constant 0 : index
    %2 = vector.load %arg4[%c0_3, %c0_4] : memref<4x512xf32, #tpu.memory_space<vmem>>, vector<4x512xf32>
    %3 = arith.subf %1, %0 : vector<4x512xf32>
    %4 = math.log %1 : vector<4x512xf32>
    %5 = arith.mulf %3, %4 : vector<4x512xf32>
    %6 = arith.subf %0, %2 : vector<4x512xf32>
    %7 = math.log %2 : vector<4x512xf32>
    %8 = arith.mulf %6, %7 : vector<4x512xf32>
    %9 = arith.addf %5, %8 : vector<4x512xf32>
    %c0_5 = arith.constant 0 : index
    %c0_6 = arith.constant 0 : index
    %10 = vector.load %arg5[%c0_5, %c0_6] : memref<4x512xf32, #tpu.memory_space<vmem>>, vector<4x512xf32>
    %c0_7 = arith.constant 0 : index
    %c0_8 = arith.constant 0 : index
    %11 = vector.load %arg7[%c0_7, %c0_8] : memref<4x512xf32, #tpu.memory_space<vmem>>, vector<4x512xf32>
    %12 = arith.subf %10, %11 : vector<4x512xf32>
    %c0_9 = arith.constant 0 : index
    %c0_10 = arith.constant 0 : index
    %13 = vector.load %arg6[%c0_9, %c0_10] : memref<4x512xf32, #tpu.memory_space<vmem>>, vector<4x512xf32>
    %c0_11 = arith.constant 0 : index
    %c0_12 = arith.constant 0 : index
    %14 = vector.load %arg8[%c0_11, %c0_12] : memref<4x512xf32, #tpu.memory_space<vmem>>, vector<4x512xf32>
    %15 = arith.subf %13, %14 : vector<4x512xf32>
    %16 = arith.mulf %12, %12 : vector<4x512xf32>
    %17 = arith.mulf %15, %15 : vector<4x512xf32>
    %18 = arith.addf %16, %17 : vector<4x512xf32>
    %cst = arith.constant 8.000000e-02 : f32
    %19 = vector.broadcast %cst : f32 to vector<4x512xf32>
    %20 = arith.mulf %19, %18 : vector<4x512xf32>
    %21 = math.exp %20 : vector<4x512xf32>
    %c0_13 = arith.constant 0 : index
    %c0_14 = arith.constant 0 : index
    %22 = memref.load %arg1[%c0_13, %c0_14] : memref<1x1xf32, #tpu.memory_space<smem>>
    %cst_15 = arith.constant 3.000000e-01 : f32
    %23 = vector.broadcast %cst_15 : f32 to vector<4x512xf32>
    %24 = arith.mulf %23, %9 : vector<4x512xf32>
    %25 = vector.broadcast %22 : f32 to vector<4x512xf32>
    %26 = arith.addf %25, %24 : vector<4x512xf32>
    %cst_16 = arith.constant 1.437500e-01 : f32
    %27 = vector.broadcast %cst_16 : f32 to vector<4x512xf32>
    %28 = arith.mulf %27, %21 : vector<4x512xf32>
    %29 = arith.addf %26, %28 : vector<4x512xf32>
    %c0_17 = arith.constant 0 : index
    %c0_18 = arith.constant 0 : index
    %30 = vector.load %arg9[%c0_17, %c0_18] : memref<4x512xf32, #tpu.memory_space<vmem>>, vector<4x512xf32>
    tpu.vector_store %arg9[%c0_17, %c0_18], %29 {strides = array<i32>} : memref<4x512xf32, #tpu.memory_space<vmem>>, vector<4x512xf32>,
    return
  }
  func.func @transform_0(%arg0: i32) -> (i32, i32) {
    %c0_i32 = arith.constant 0 : i32
    %c0_i32_0 = arith.constant 0 : i32
    %c0_i32_1 = arith.constant 0 : i32
    return %c0_i32, %c0_i32_0 : i32, i32
  }
  func.func @transform_1(%arg0: i32) -> (i32, i32) {
    %c0_i32 = arith.constant 0 : i32
    %c0_i32_0 = arith.constant 0 : i32
    return %arg0, %c0_i32 : i32, i32
  }
  func.func @transform_2(%arg0: i32) -> (i32, i32) {
    %c0_i32 = arith.constant 0 : i32
    %c0_i32_0 = arith.constant 0 : i32
    return %arg0, %c0_i32 : i32, i32
  }
  func.func @transform_3(%arg0: i32) -> (i32, i32) {
    %c0_i32 = arith.constant 0 : i32
    %c0_i32_0 = arith.constant 0 : i32
    return %arg0, %c0_i32 : i32, i32
  }
  func.func @transform_4(%arg0: i32) -> (i32, i32) {
    %c0_i32 = arith.constant 0 : i32
    %c0_i32_0 = arith.constant 0 : i32
    return %arg0, %c0_i32 : i32, i32
  }
  func.func @transform_5(%arg0: i32) -> (i32, i32) {
    %c0_i32 = arith.constant 0 : i32
    %c0_i32_0 = arith.constant 0 : i32
    return %arg0, %c0_i32 : i32, i32
  }
  func.func @transform_6(%arg0: i32) -> (i32, i32) {
    %c0_i32 = arith.constant 0 : i32
    %c0_i32_0 = arith.constant 0 : i32
    return %arg0, %c0_i32 : i32, i32
  }
  func.func @transform_7(%arg0: i32) -> (i32, i32) {
    %c0_i32 = arith.constant 0 : i32
    %c0_i32_0 = arith.constant 0 : i32
    return %arg0, %c0_i32 : i32, i32
  }
  func.func @transform_8(%arg0: i32) -> (i32, i32) {
    %c0_i32 = arith.constant 0 : i32
    %c0_i32_0 = arith.constant 0 : i32
    return %arg0, %c0_i32 : i32, i32
  }
}

</mosaic_0001>

<bundles_post_ra>
// kernel: custom_loss.2
= control target key start
LH: loop header
LB: loop body
LE: loop exit
PB: predicated region body
PF: predicated region fallthrough
CT: control target
= control target key end

     0   :  { %vm55_vm2 = vcmask 1043456   ;;  %v72_v52 = vlaneseq  ;;  %s126_s0 = inlined_call_operand.vmem [shape: f32[4,512], index: 0, kind: input, shape index: {}]   ;;  %s127_s1 = inlined_call_operand.vmem [shape: f32[4,512], index: 1, kind: input, shape index: {}]   ;;  %s128_s2 = inlined_call_operand.vmem [shape: f32[1,8,128], index: 2, kind: output, shape index: {}]  }
   0x1   :  { %v11_v0 = vld [vmem:[%s126_s0] sm:$0xff]  ;;  %v12_v1 = vld [vmem:[%s126_s0 + $0x8] sm:$0xff] }
   0x2   :  { %v21_v2 = vand.u32 2147483647, %v11_v0  ;;  %v22_v3 = vand.u32 2147483647, %v12_v1  ;;  %v13_v14 = vld [vmem:[%s127_s1] sm:$0xff]  ;;  %v14_v15 = vld [vmem:[%s127_s1 + $0x8] sm:$0xff] }
   0x3   :  { %v15_v17 = vmax.f32 %v11_v0, 0.0  ;;  %v17_v18 = vmul.f32 %v13_v14, %v11_v0  ;;  %v16_v21 = vmax.f32 %v12_v1, 0.0  ;;  %v18_v22 = vmul.f32 %v14_v15, %v12_v1 }
   0x4   :  { %v23_v4 = vsub.f32 0.0, %v21_v2  ;;  %v24_v5 = vsub.f32 0.0, %v22_v3  ;;  %v73_v53 = vshrl.u32 %v72_v52, 7  ;;  %v75_v54 = vand.u32 127, %v72_v52 }
   0x5   :  { %v19_v26 = vsub.f32 %v15_v17, %v17_v18  ;;  %v20_v29 = vsub.f32 %v16_v21, %v18_v22 }
   0x6   :  { %v25_v6 = vmul.f32 1.442695, %v23_v4  ;;  %v27_v7 = vmul.f32 1.442695, %v24_v5  ;;  %vm76_vm3 = vcmp.eq.s32.totalorder %v73_v53, 0  ;;  %vm77_vm4 = vcmp.eq.s32.totalorder %v75_v54, 0 }
   0x7   :  { %vm78_vm5 = vmand %vm76_vm3, %vm77_vm4 }
   0x8   :  { %88 = vpow2.f32 %v25_v6 }
   0x9   :  { %90 = vpow2.f32 %v27_v7 }
  0x12   :  { %v89_v8 = vpop.eup %88 }
  0x13   :  { %v91_v9 = vpop.eup %90  ;;  %v29_v10 = vadd.f32 1.0, %v89_v8  ;;  %v32_v12 = vmul.f32 -0.5, %v89_v8  ;;  %v35_v19 = vand.u32 2147483647, %v89_v8 }
  0x14   :  { %v38_v11 = vadd.f32 1.0, %v91_v9  ;;  %v41_v13 = vmul.f32 -0.5, %v91_v9  ;;  %v44_v23 = vand.u32 2147483647, %v91_v9 }
  0x15   :  { %92 = vlog2.f32 %v29_v10  ;;  %v33_v16 = vadd.f32 1.0, %v32_v12  ;;  %vm36_vm0 = vcmp.lt.f32.partialorder %v35_v19, 0.0004427343 }
  0x16   :  { %94 = vlog2.f32 %v38_v11  ;;  %v42_v20 = vadd.f32 1.0, %v41_v13  ;;  %vm45_vm1 = vcmp.lt.f32.partialorder %v44_v23, 0.0004427343 }
  0x17   :  { %v34_v24 = vmul.f32 %v89_v8, %v33_v16 }
  0x18   :  { %v43_v27 = vmul.f32 %v91_v9, %v42_v20 }
  0x1f   :  { %v93_v25 = vpop.eup %92 }
  0x20   :  { %v95_v28 = vpop.eup %94  ;;  %v31_v30 = vmul.f32 0.6931472, %v93_v25 }
  0x21   :  { %v40_v31 = vmul.f32 0.6931472, %v95_v28 }
  0x22   :  { %v37_v32 = vsel %vm36_vm0, %v34_v24, %v31_v30 }
  0x23   :  { %v46_v33 = vsel %vm45_vm1, %v43_v27, %v40_v31  ;;  %v47_v34 = vadd.f32 %v37_v32, %v19_v26 }
  0x24   :  { %v48_v35 = vadd.f32 %v46_v33, %v20_v29 }
  0x25   :  { %v51_v36 = vcombine.high %v47_v34, %v47_v34  ;;  %v56_v37 = vsel %vm55_vm2, %v47_v34, 0.0 }
  0x26   :  { %v52_v38 = vcombine.high %v48_v35, %v48_v35  ;;  %v59_v40 = vsel %vm55_vm2, %v48_v35, 0.0 }
  0x27   :  { %v57_v39 = vsel %vm55_vm2, %v51_v36, 0.0 }
  0x28   :  { %v58_v41 = vadd.f32 %v57_v39, %v56_v37  ;;  %v61_v42 = vsel %vm55_vm2, %v52_v38, 0.0 }
  0x2a   :  { %v60_v43 = vadd.f32 %v59_v40, %v58_v41 }
  0x2c   :  { %v62_v44 = vadd.f32 %v61_v42, %v60_v43 }
  0x2e   :  { %63 = vadd.xlane.f32.xlu0 %v62_v44 }
  0xbb   :  { %v64_v45 = vpop.xlane.xlu0 %63 }
  0xbc   :  { %v65_v46 = vrot.slane %v64_v45, 4 }
  0xbe   :  { %v66_v47 = vadd.f32 %v65_v46, %v64_v45 }
  0xc0   :  { %v67_v48 = vrot.slane %v66_v47, 2 }
  0xc2   :  { %v68_v49 = vadd.f32 %v67_v48, %v66_v47 }
  0xc4   :  { %v69_v50 = vrot.slane %v68_v49, 1 }
  0xc6   :  { %v70_v51 = vadd.f32 %v69_v50, %v68_v49 }
  0xc8   :  { %86 = vpush %v70_v51 }
  0xf9   :  { %s87_s1 = spop %86 }
  0xfa   :  { %v79_v55 = vstv %s87_s1 }
  0xfb   :  { %v80_v56 = vsel %vm78_vm5, %v79_v55, 0.0 }
  0xfc   :  { %81 = vst [vmem:[%s128_s2] sm:$0xff] %v80_v56 }

// kernel: custom_loss.3
= control target key start
LH: loop header
LB: loop body
LE: loop exit
PB: predicated region body
PF: predicated region fallthrough
CT: control target
= control target key end

     0   :  { %s202_s2 = inlined_call_operand.vmem [shape: f32[4,512], index: 2, kind: input, shape index: {}]   ;;  %s203_s3 = inlined_call_operand.vmem [shape: f32[4,512], index: 3, kind: input, shape index: {}]   ;;  %s204_s4 = inlined_call_operand.vmem [shape: f32[4,512], index: 4, kind: input, shape index: {}]   ;;  %s205_s5 = inlined_call_operand.vmem [shape: f32[4,512], index: 5, kind: input, shape index: {}]   ;;  %s206_s6 = inlined_call_operand.vmem [shape: f32[4,512], index: 6, kind: input, shape index: {}]   ;;  %s207_s7 = inlined_call_operand.vmem [shape: f32[4,512], index: 7, kind: input, shape index: {}]   ;;  %s208_s1 = inlined_call_operand.vmem [shape: f32[4,512], index: 1, kind: input, shape index: {}]   ;;  %s209_s0 = inlined_call_operand.<no memory space> [shape: f32[1,1], index: 0, kind: input, shape index: {}]   ;;  %s210_s8 = inlined_call_operand.vmem [shape: f32[4,512], index: 8, kind: output, shape index: {}]  }
   0x1   :  { %v32_v0 = vld [vmem:[%s202_s2] sm:$0xff]  ;;  %v33_v7 = vld [vmem:[%s202_s2 + $0x8] sm:$0xff]  ;;  %v81_v46 = vstv %s209_s0 }
   0x2   :  { %v34_v1 = vld [vmem:[%s203_s3] sm:$0xff]  ;;  %94 = vlog2.f32 %v32_v0  ;;  %v35_v9 = vld [vmem:[%s203_s3 + $0x8] sm:$0xff] }
   0x3   :  { %v54_v2 = vld [vmem:[%s204_s4] sm:$0xff]  ;;  %96 = vlog2.f32 %v34_v1  ;;  %v55_v10 = vld [vmem:[%s204_s4 + $0x8] sm:$0xff] }
   0x4   :  { %v56_v3 = vld [vmem:[%s206_s6] sm:$0xff]  ;;  %98 = vlog2.f32 %v33_v7  ;;  %v57_v11 = vld [vmem:[%s206_s6 + $0x8] sm:$0xff] }
   0x5   :  { %v60_v4 = vld [vmem:[%s205_s5] sm:$0xff]  ;;  %v58_v5 = vsub.f32 %v54_v2, %v56_v3  ;;  %100 = vlog2.f32 %v35_v9  ;;  %v59_v13 = vsub.f32 %v55_v10, %v57_v11  ;;  %v61_v14 = vld [vmem:[%s205_s5 + $0x8] sm:$0xff] }
   0x6   :  { %v62_v6 = vld [vmem:[%s207_s7] sm:$0xff]  ;;  %v63_v15 = vld [vmem:[%s207_s7 + $0x8] sm:$0xff] }
   0x7   :  { %v64_v8 = vsub.f32 %v60_v4, %v62_v6  ;;  %v66_v12 = vmul.f32 %v58_v5, %v58_v5  ;;  %v65_v17 = vsub.f32 %v61_v14, %v63_v15  ;;  %v67_v18 = vmul.f32 %v59_v13, %v59_v13  ;;  %v30_v19 = vld [vmem:[%s208_s1] sm:$0xff]  ;;  %v31_v23 = vld [vmem:[%s208_s1 + $0x8] sm:$0xff] }
   0x8   :  { %v36_v25 = vsub.f32 %v32_v0, %v30_v19  ;;  %v44_v27 = vsub.f32 %v30_v19, %v34_v1  ;;  %v37_v32 = vsub.f32 %v33_v7, %v31_v23  ;;  %v45_v35 = vsub.f32 %v31_v23, %v35_v9 }
   0x9   :  { %v68_v16 = vmul.f32 %v64_v8, %v64_v8  ;;  %v69_v21 = vmul.f32 %v65_v17, %v65_v17 }
   0xb   :  { %v70_v20 = vadd.f32 %v68_v16, %v66_v12  ;;  %v71_v24 = vadd.f32 %v69_v21, %v67_v18 }
   0xc   :  { %v95_v26 = vpop.eup %94 }
   0xd   :  { %v72_v22 = vmul.f32 0.08, %v70_v20  ;;  %v73_v29 = vmul.f32 0.08, %v71_v24  ;;  %v97_v30 = vpop.eup %96  ;;  %v39_v31 = vmul.f32 0.6931472, %v95_v26 }
   0xe   :  { %v99_v33 = vpop.eup %98  ;;  %v47_v34 = vmul.f32 0.6931472, %v97_v30 }
   0xf   :  { %v74_v28 = vmul.f32 1.442695, %v72_v22  ;;  %v76_v36 = vmul.f32 1.442695, %v73_v29  ;;  %v101_v37 = vpop.eup %100  ;;  %v42_v38 = vmul.f32 %v39_v31, %v36_v25  ;;  %v41_v39 = vmul.f32 0.6931472, %v99_v33 }
  0x10   :  { %v50_v40 = vmul.f32 %v47_v34, %v44_v27  ;;  %v49_v41 = vmul.f32 0.6931472, %v101_v37 }
  0x11   :  { %102 = vpow2.f32 %v74_v28  ;;  %v43_v42 = vmul.f32 %v41_v39, %v37_v32 }
  0x12   :  { %104 = vpow2.f32 %v76_v36  ;;  %v52_v43 = vadd.f32 %v50_v40, %v42_v38  ;;  %v51_v44 = vmul.f32 %v49_v41, %v45_v35 }
  0x14   :  { %v79_v45 = vmul.f32 0.3, %v52_v43  ;;  %v53_v47 = vadd.f32 %v51_v44, %v43_v42 }
  0x16   :  { %v80_v48 = vmul.f32 0.3, %v53_v47  ;;  %v82_v49 = vadd.f32 %v81_v46, %v79_v45 }
  0x18   :  { %v83_v52 = vadd.f32 %v81_v46, %v80_v48 }
  0x1b   :  { %v103_v50 = vpop.eup %102 }
  0x1c   :  { %v84_v51 = vmul.f32 0.14375, %v103_v50  ;;  %v105_v53 = vpop.eup %104 }
  0x1d   :  { %v85_v55 = vmul.f32 0.14375, %v105_v53 }
  0x1e   :  { %v86_v54 = vadd.f32 %v84_v51, %v82_v49 }
  0x1f   :  { %v87_v56 = vadd.f32 %v85_v55, %v83_v52 }
  0x20   :  { %88 = vst [vmem:[%s210_s8] sm:$0xff] %v86_v54 }
  0x21   :  { %89 = vst [vmem:[%s210_s8 + $0x8] sm:$0xff] %v87_v56 }

</bundles_post_ra>
